<compile_context>
chip_gen: v6e
topology: v6e:2x2x1
jax: 0.10.0
libtpu: 0.0.40
codegen_flags: <defaults>
</compile_context>

<pallas_src>
import jax
import jax.numpy as jnp
from jax.experimental import pallas as pl
from jax.experimental.pallas import tpu as pltpu

# ----- module hyper-parameters (synthetic, small) -----
INPUT_DIM = 32          # input_dim
AUX_DIM = 16            # auxiliary_dim
FILTER_DIM = 64         # filter_dim
AUX_OUT = 8             # output width of w_aux Linear
N_ROWS = 16             # number of (unary, pair) rows

GATE_WEIGHT = 0.5       # self.gate_weight      (use_auxiliary_gate_weight=False)
AUX_GATE_WEIGHT = 0.5   # self.aux_gate_weight
LN_EPS = 1e-5

LANES = 128                         # packed input slab width
OUT_LANES = 64                      # packed output slab width
TWO_D = 2 * INPUT_DIM               # 64
BIAS_LANE = TWO_D + AUX_DIM         # 80 (constant-1.0 activation lane)


def _round_up(x, m):
    return ((x + m - 1) // m) * m


# --------------------------------------------------------------------------
# Kernel
# --------------------------------------------------------------------------
def mpu_gate_kernel(x_ref, ln_ref, w_ref, m_ref, out_ref):
    x = x_ref[...].astype(jnp.float32)                  # (nt, 128) packed rows
    nt, lanes = x.shape

    lane = jax.lax.broadcasted_iota(jnp.int32, (nt, lanes), 1)
    up_mask = lane < TWO_D                               # pair | unary lanes
    aux_mask = (lane >= TWO_D) & (lane < BIAS_LANE)      # aux lanes

    # --- paired = relu(cat([unary, pair])) + LayerNorm over the 2d concat ----
    r = jnp.where(up_mask, jnp.maximum(x, 0.0), 0.0)
    mu = jnp.sum(r, -1, keepdims=True) * (1.0 / TWO_D)
    d_up = jnp.where(up_mask, r - mu, 0.0)
    var = jnp.sum(d_up * d_up, -1, keepdims=True) * (1.0 / TWO_D)
    rstd = jax.lax.rsqrt(var + LN_EPS)

    # --- auxiliary path: LayerNorm(aux_dim) -----------------------------------
    av = jnp.where(aux_mask, x, 0.0)
    amu = jnp.sum(av, -1, keepdims=True) * (1.0 / AUX_DIM)
    d_a = jnp.where(aux_mask, x - amu, 0.0)
    avar = jnp.sum(d_a * d_a, -1, keepdims=True) * (1.0 / AUX_DIM)
    arstd = jax.lax.rsqrt(avar + LN_EPS)

    # masks are disjoint, so the two normalized halves just add
    norm = d_up * rstd + d_a * arstd

    lnp = ln_ref[...]                                    # (2, 128)
    gamma = lnp[0:1, :]
    beta = lnp[1:2, :]
    # lane 80: gamma=0, beta=1 -> act==1 (drives the bias row of the weight slab)
    # lanes 81..127: gamma=beta=0 -> act==0
    act = jnp.maximum(norm * gamma + beta, 0.0)          # (nt, 128)

    # --- single fused K=128 MXU matmul (weights + both biases folded in) ------
    w = w_ref[...]
    h = jnp.dot(act.astype(w.dtype), w, preferred_element_type=jnp.float32)
    sig = jax.nn.sigmoid(h)                              # (nt, 128)

    # --- both sigmoid means via one small matmul against the mean matrix ------
    sums = jnp.dot(sig, m_ref[...], preferred_element_type=jnp.float32)
    gate = sums[:, 0:1]                                  # mean over filter_dim
    aux_gate = sums[:, 1:2]                              # mean over 8 aux cols

    # sigmoid(0.5*logit(clamp(a)) + 0.5*logit(clamp(b)))
    #   == 1 / (1 + sqrt(((1-a)*(1-b)) / (a*b)))     (valid for 0.5/0.5 weights)
    a_c = jnp.clip(gate, 0.001, 0.999)
    b_c = jnp.clip(aux_gate, 0.001, 0.999)
    ratio = ((1.0 - a_c) * (1.0 - b_c)) / (a_c * b_c)    # (nt,1) tail, exact
    g = 1.0 / (1.0 + jnp.sqrt(ratio))

    # --- packed output: lanes [0,32) = pair*g, lanes [32,64) = g --------------
    lane_o = jax.lax.broadcasted_iota(jnp.int32, (nt, OUT_LANES), 1)
    pair_part = x[:, :OUT_LANES]                         # pair | unary lanes
    out = jnp.where(lane_o < INPUT_DIM, pair_part * g, g)
    out_ref[...] = out.astype(out_ref.dtype)


# --------------------------------------------------------------------------
# Wrapper
# --------------------------------------------------------------------------
def mpu_gating_forward(unary_term, pair_term, auxiliary_term, params, *,
                       row_tile=None, use_bf16_matmul=False):
    # the algebraic gate combine in the kernel assumes the 0.5/0.5 weights
    assert GATE_WEIGHT == 0.5 and AUX_GATE_WEIGHT == 0.5

    # broadcast rules from the PyTorch module (plain-JAX glue)
    if unary_term.shape[0] == 1 and pair_term.shape[0] > 1:
        unary_term = jnp.broadcast_to(unary_term, (pair_term.shape[0], unary_term.shape[1]))
    if unary_term.shape[0] > 1 and pair_term.shape[0] == 1:
        pair_term = jnp.broadcast_to(pair_term, (unary_term.shape[0], pair_term.shape[1]))

    n, d = pair_term.shape
    a = auxiliary_term.shape[1]
    assert d == INPUT_DIM and a == AUX_DIM

    if row_tile is None:
        # <=512 rows per step: bounded VMEM, pipelined DMA, megacore-splittable
        row_tile = min(512, _round_up(n, 8))
    n_pad = _round_up(n, row_tile)

    # pack the three row inputs into one lane-dense (n_pad, 128) slab
    # lanes [0,32)=pair  [32,64)=unary  [64,80)=aux  [80,128)=0
    pad_fill = jnp.zeros((n, LANES - TWO_D - a), jnp.float32)
    x = jnp.concatenate([pair_term.astype(jnp.float32),
                         unary_term.astype(jnp.float32),
                         auxiliary_term.astype(jnp.float32),
                         pad_fill], axis=1)
    if n_pad != n:
        x = jnp.pad(x, ((0, n_pad - n), (0, 0)))

    w_slab = params["w"].astype(jnp.bfloat16) if use_bf16_matmul else params["w"]

    grid = (n_pad // row_tile,)
    row_spec = pl.BlockSpec((row_tile, LANES), lambda i: (i, 0))
    const = lambda r, c: pl.BlockSpec((r, c), lambda i: (0, 0))

    out_slab = pl.pallas_call(
        mpu_gate_kernel,
        out_shape=jax.ShapeDtypeStruct((n_pad, OUT_LANES), pair_term.dtype),
        grid_spec=pltpu.PrefetchScalarGridSpec(
            num_scalar_prefetch=0,
            grid=grid,
            in_specs=[
                row_spec,                 # packed rows
                const(2, LANES),          # LayerNorm gamma/beta slab
                const(LANES, LANES),      # fused block-diagonal weight (+bias)
                const(LANES, LANES),      # mean matrix
            ],
            out_specs=pl.BlockSpec((row_tile, OUT_LANES), lambda i: (i, 0)),
        ),
        compiler_params=pltpu.CompilerParams(
            dimension_semantics=("parallel",)),
    )(x, params["ln"], w_slab, params["m"])

    out = out_slab[:n, :d]
    gate = out_slab[:n, d].astype(jnp.float32)
    return out, gate


# --------------------------------------------------------------------------
# Parameters
# --------------------------------------------------------------------------
def make_raw_params(key):
    """Parameters in the module's native layout (Linear stored as (in, out))."""
    ks = jax.random.split(key, 4)
    d2 = 2 * INPUT_DIM
    return {
        # LayerNorm(input_dim*2): gamma=1, beta=0 (PyTorch default)
        "ln_w_g": jnp.ones((1, d2), jnp.float32),
        "ln_w_b": jnp.zeros((1, d2), jnp.float32),
        # Linear(input_dim*2 -> filter_dim)
        "w_w": jax.random.normal(ks[0], (d2, FILTER_DIM), jnp.float32) * 0.05,
        "w_b": jax.random.normal(ks[1], (1, FILTER_DIM), jnp.float32) * 0.05,
        # LayerNorm(auxiliary_dim)
        "ln_a_g": jnp.ones((1, AUX_DIM), jnp.float32),
        "ln_a_b": jnp.zeros((1, AUX_DIM), jnp.float32),
        # Linear(auxiliary_dim -> 8)
        "wa_w": jax.random.normal(ks[2], (AUX_DIM, AUX_OUT), jnp.float32) * 0.05,
        "wa_b": jax.random.normal(ks[3], (1, AUX_OUT), jnp.float32) * 0.05,
    }


def prepare_params(raw):
    """One-time reshaping into three dense constant slabs.

    Lane layout (matching the packed activation):
      [0,32)=pair  [32,64)=unary  [64,80)=aux  80=bias driver  [81,128)=padding
    Column layout of the fused weight:
      [0,64)=main Linear  [64,72)=aux Linear  [72,128)=padding (bias -30)
    """
    d, a, f, ao = INPUT_DIM, AUX_DIM, FILTER_DIM, AUX_OUT
    two_d = 2 * d

    # (2, 128) LayerNorm gamma/beta slab
    gamma = jnp.zeros((LANES,), jnp.float32)
    beta = jnp.zeros((LANES,), jnp.float32)
    gamma = gamma.at[0:d].set(raw["ln_w_g"][0, d:])        # pair half of LN(2d)
    gamma = gamma.at[d:two_d].set(raw["ln_w_g"][0, :d])    # unary half
    gamma = gamma.at[two_d:two_d + a].set(raw["ln_a_g"][0])
    beta = beta.at[0:d].set(raw["ln_w_b"][0, d:])
    beta = beta.at[d:two_d].set(raw["ln_w_b"][0, :d])
    beta = beta.at[two_d:two_d + a].set(raw["ln_a_b"][0])
    beta = beta.at[BIAS_LANE].set(1.0)                     # constant-1 activation
    ln_slab = jnp.stack([gamma, beta], axis=0)

    # (128, 128) fused block-diagonal weight with biases folded into row 80
    W = jnp.zeros((LANES, LANES), jnp.float32)
    W = W.at[0:d, 0:f].set(raw["w_w"][d:, :])              # pair rows of Linear
    W = W.at[d:two_d, 0:f].set(raw["w_w"][:d, :])          # unary rows
    W = W.at[two_d:two_d + a, f:f + ao].set(raw["wa_w"])   # aux Linear
    W = W.at[BIAS_LANE, 0:f].set(raw["w_b"][0])
    W = W.at[BIAS_LANE, f:f + ao].set(raw["wa_b"][0])
    W = W.at[BIAS_LANE, f + ao:].set(-30.0)                # sigmoid(padded)~0

    # (128, 128) mean matrix: col 0 = mean of main sigmoids, col 1 = aux mean
    M = jnp.zeros((LANES, LANES), jnp.float32)
    M = M.at[0:f, 0].set(1.0 / f)
    M = M.at[f:f + ao, 1].set(1.0 / ao)

    return {"ln": ln_slab, "w": W, "m": M}


# --------------------------------------------------------------------------
# Pure-JAX reference (original PyTorch formulation, incl. logit-form combine)
# --------------------------------------------------------------------------
def _reverse_sigmoid(x):
    xc = jnp.clip(x, 0.001, 0.999)
    return jnp.log(xc / (1.0 - xc))


def reference_forward(unary, pair, aux, p):
    paired = jax.nn.relu(jnp.concatenate([unary, pair], axis=1))
    mu = paired.mean(-1, keepdims=True)
    var = ((paired - mu) ** 2).mean(-1, keepdims=True)
    xn = jax.nn.relu((paired - mu) / jnp.sqrt(var + LN_EPS) * p["ln_w_g"] + p["ln_w_b"])
    gate = jax.nn.sigmoid(xn @ p["w_w"] + p["w_b"]).mean(1)

    amu = aux.mean(-1, keepdims=True)
    avar = ((aux - amu) ** 2).mean(-1, keepdims=True)
    an = jax.nn.relu((aux - amu) / jnp.sqrt(avar + LN_EPS) * p["ln_a_g"] + p["ln_a_b"])
    aux_gate = jax.nn.sigmoid(an @ p["wa_w"] + p["wa_b"]).mean(1)

    g = jax.nn.sigmoid(GATE_WEIGHT * _reverse_sigmoid(gate)
                       + AUX_GATE_WEIGHT * _reverse_sigmoid(aux_gate))
    return pair * g[:, None], g


if __name__ == "__main__":
    key = jax.random.PRNGKey(0)
    k_u, k_p, k_a, k_w = jax.random.split(key, 4)

    unary = jax.random.normal(k_u, (N_ROWS, INPUT_DIM), jnp.float32)
    pair = jax.random.normal(k_p, (N_ROWS, INPUT_DIM), jnp.float32)
    aux = jax.random.normal(k_a, (N_ROWS, AUX_DIM), jnp.float32)

    raw = make_raw_params(k_w)
    params = prepare_params(raw)

    out, gate = mpu_gating_forward(unary, pair, aux, params)
    jax.block_until_ready(out)
    jax.block_until_ready(gate)

    out_ref, gate_ref = reference_forward(unary, pair, aux, raw)
    assert jnp.allclose(out, out_ref, atol=1e-5, rtol=1e-5)
    assert jnp.allclose(gate, gate_ref, atol=1e-5, rtol=1e-5)

    # TODO(synk): use_auxiliary_gate_weight=True path (0.33/0.33 weights + extra
    # elementwise multiply by auxiliary_gating_weight) needs the general logit
    # combine and one extra row input; not exercised here.
    print("KERNEL_OK")
</pallas_src>

<mosaic_0001>
module attributes {stable_mosaic.version = 11 : i64} {
  func.func @mpu_gate_kernel(%arg0: i32, %arg1: memref<16x128xf32, #tpu.memory_space<vmem>>, %arg2: memref<2x128xf32, #tpu.memory_space<vmem>>, %arg3: memref<128x128xf32, #tpu.memory_space<vmem>>, %arg4: memref<128x128xf32, #tpu.memory_space<vmem>>, %arg5: memref<16x64xf32, #tpu.memory_space<vmem>>) attributes {dimension_semantics = [#tpu.dimension_semantics<parallel>], iteration_bounds = array<i64: 1>, scalar_prefetch = 0 : i64, scratch_operands = 0 : i64, tpu.core_type = #tpu.core_type<tc>, window_params = [{transform_indices = @transform_0, window_bounds = array<i64: 16, 128>}, {pipeline_mode = #tpu.pipeline_mode<synchronous>, transform_indices = @transform_1, window_bounds = array<i64: 2, 128>}, {pipeline_mode = #tpu.pipeline_mode<synchronous>, transform_indices = @transform_2, window_bounds = array<i64: 128, 128>}, {pipeline_mode = #tpu.pipeline_mode<synchronous>, transform_indices = @transform_3, window_bounds = array<i64: 128, 128>}, {transform_indices = @transform_4, window_bounds = array<i64: 16, 64>}]} {
    %c0 = arith.constant 0 : index
    %c0_0 = arith.constant 0 : index
    %0 = vector.load %arg1[%c0, %c0_0] : memref<16x128xf32, #tpu.memory_space<vmem>>, vector<16x128xf32>
    %1 = tpu.iota {dimensions = array<i32: 1>} : vector<16x128xi32>
    %c64_i32 = arith.constant 64 : i32
    %2 = vector.broadcast %c64_i32 : i32 to vector<16x128xi32>
    %3 = arith.cmpi slt, %1, %2 : vector<16x128xi32>
    %c64_i32_1 = arith.constant 64 : i32
    %4 = vector.broadcast %c64_i32_1 : i32 to vector<16x128xi32>
    %5 = arith.cmpi sge, %1, %4 : vector<16x128xi32>
    %c80_i32 = arith.constant 80 : i32
    %6 = vector.broadcast %c80_i32 : i32 to vector<16x128xi32>
    %7 = arith.cmpi slt, %1, %6 : vector<16x128xi32>
    %8 = arith.andi %5, %7 : vector<16x128xi1>
    %cst = arith.constant 0.000000e+00 : f32
    %9 = vector.broadcast %cst : f32 to vector<16x128xf32>
    %10 = arith.maximumf %0, %9 : vector<16x128xf32>
    %cst_2 = arith.constant 0.000000e+00 : f32
    %11 = vector.broadcast %cst_2 : f32 to vector<16x128xf32>
    %12 = arith.select %3, %10, %11 : vector<16x128xi1>, vector<16x128xf32>
    %cst_3 = arith.constant dense<0.000000e+00> : vector<16xf32>
    %13 = vector.multi_reduction <add>, %12, %cst_3 [1] : vector<16x128xf32> to vector<16xf32>
    %14 = vector.shape_cast %13 : vector<16xf32> to vector<16x1xf32>
    %cst_4 = arith.constant 1.562500e-02 : f32
    %15 = vector.broadcast %cst_4 : f32 to vector<16x1xf32>
    %16 = arith.mulf %14, %15 : vector<16x1xf32>
    %17 = vector.broadcast %16 : vector<16x1xf32> to vector<16x128xf32>
    %18 = arith.subf %12, %17 : vector<16x128xf32>
    %cst_5 = arith.constant 0.000000e+00 : f32
    %19 = vector.broadcast %cst_5 : f32 to vector<16x128xf32>
    %20 = arith.select %3, %18, %19 : vector<16x128xi1>, vector<16x128xf32>
    %21 = arith.mulf %20, %20 : vector<16x128xf32>
    %cst_6 = arith.constant dense<0.000000e+00> : vector<16xf32>
    %22 = vector.multi_reduction <add>, %21, %cst_6 [1] : vector<16x128xf32> to vector<16xf32>
    %23 = vector.shape_cast %22 : vector<16xf32> to vector<16x1xf32>
    %cst_7 = arith.constant 1.562500e-02 : f32
    %24 = vector.broadcast %cst_7 : f32 to vector<16x1xf32>
    %25 = arith.mulf %23, %24 : vector<16x1xf32>
    %cst_8 = arith.constant 9.99999974E-6 : f32
    %26 = vector.broadcast %cst_8 : f32 to vector<16x1xf32>
    %27 = arith.addf %25, %26 : vector<16x1xf32>
    %28 = math.rsqrt %27 : vector<16x1xf32>
    %cst_9 = arith.constant 0.000000e+00 : f32
    %29 = vector.broadcast %cst_9 : f32 to vector<16x128xf32>
    %30 = arith.select %8, %0, %29 : vector<16x128xi1>, vector<16x128xf32>
    %cst_10 = arith.constant dense<0.000000e+00> : vector<16xf32>
    %31 = vector.multi_reduction <add>, %30, %cst_10 [1] : vector<16x128xf32> to vector<16xf32>
    %32 = vector.shape_cast %31 : vector<16xf32> to vector<16x1xf32>
    %cst_11 = arith.constant 6.250000e-02 : f32
    %33 = vector.broadcast %cst_11 : f32 to vector<16x1xf32>
    %34 = arith.mulf %32, %33 : vector<16x1xf32>
    %35 = vector.broadcast %34 : vector<16x1xf32> to vector<16x128xf32>
    %36 = arith.subf %0, %35 : vector<16x128xf32>
    %cst_12 = arith.constant 0.000000e+00 : f32
    %37 = vector.broadcast %cst_12 : f32 to vector<16x128xf32>
    %38 = arith.select %8, %36, %37 : vector<16x128xi1>, vector<16x128xf32>
    %39 = arith.mulf %38, %38 : vector<16x128xf32>
    %cst_13 = arith.constant dense<0.000000e+00> : vector<16xf32>
    %40 = vector.multi_reduction <add>, %39, %cst_13 [1] : vector<16x128xf32> to vector<16xf32>
    %41 = vector.shape_cast %40 : vector<16xf32> to vector<16x1xf32>
    %cst_14 = arith.constant 6.250000e-02 : f32
    %42 = vector.broadcast %cst_14 : f32 to vector<16x1xf32>
    %43 = arith.mulf %41, %42 : vector<16x1xf32>
    %cst_15 = arith.constant 9.99999974E-6 : f32
    %44 = vector.broadcast %cst_15 : f32 to vector<16x1xf32>
    %45 = arith.addf %43, %44 : vector<16x1xf32>
    %46 = math.rsqrt %45 : vector<16x1xf32>
    %47 = vector.broadcast %28 : vector<16x1xf32> to vector<16x128xf32>
    %48 = arith.mulf %20, %47 : vector<16x128xf32>
    %49 = vector.broadcast %46 : vector<16x1xf32> to vector<16x128xf32>
    %50 = arith.mulf %38, %49 : vector<16x128xf32>
    %51 = arith.addf %48, %50 : vector<16x128xf32>
    %c0_16 = arith.constant 0 : index
    %c0_17 = arith.constant 0 : index
    %52 = vector.load %arg2[%c0_16, %c0_17] : memref<2x128xf32, #tpu.memory_space<vmem>>, vector<2x128xf32>
    %53 = vector.extract_strided_slice %52 {offsets = [0, 0], sizes = [1, 128], strides = [1, 1]} : vector<2x128xf32> to vector<1x128xf32>
    %54 = vector.extract_strided_slice %52 {offsets = [1, 0], sizes = [1, 128], strides = [1, 1]} : vector<2x128xf32> to vector<1x128xf32>
    %55 = vector.broadcast %53 : vector<1x128xf32> to vector<16x128xf32>
    %56 = arith.mulf %51, %55 : vector<16x128xf32>
    %57 = vector.broadcast %54 : vector<1x128xf32> to vector<16x128xf32>
    %58 = arith.addf %56, %57 : vector<16x128xf32>
    %cst_18 = arith.constant 0.000000e+00 : f32
    %59 = vector.broadcast %cst_18 : f32 to vector<16x128xf32>
    %60 = arith.maximumf %58, %59 : vector<16x128xf32>
    %c0_19 = arith.constant 0 : index
    %c0_20 = arith.constant 0 : index
    %61 = vector.load %arg3[%c0_19, %c0_20] : memref<128x128xf32, #tpu.memory_space<vmem>>, vector<128x128xf32>
    %cst_21 = arith.constant dense<0.000000e+00> : vector<16x128xf32>
    %62 = tpu.matmul %60, %61, %cst_21 {dimension_numbers = #tpu.dot_dimension_numbers<[1], [0], [0], [1], [0, 0, 1, 1], [], []>} : vector<16x128xf32>, vector<128x128xf32>, vector<16x128xf32> -> vector<16x128xf32>
    %63 = arith.negf %62 : vector<16x128xf32>
    %64 = math.exp %63 : vector<16x128xf32>
    %cst_22 = arith.constant 1.000000e+00 : f32
    %65 = vector.broadcast %cst_22 : f32 to vector<16x128xf32>
    %66 = arith.addf %65, %64 : vector<16x128xf32>
    %67 = arith.divf %65, %66 : vector<16x128xf32>
    %c0_23 = arith.constant 0 : index
    %c0_24 = arith.constant 0 : index
    %68 = vector.load %arg4[%c0_23, %c0_24] : memref<128x128xf32, #tpu.memory_space<vmem>>, vector<128x128xf32>
    %cst_25 = arith.constant dense<0.000000e+00> : vector<16x128xf32>
    %69 = tpu.matmul %67, %68, %cst_25 {dimension_numbers = #tpu.dot_dimension_numbers<[1], [0], [0], [1], [0, 0, 1, 1], [], []>} : vector<16x128xf32>, vector<128x128xf32>, vector<16x128xf32> -> vector<16x128xf32>
    %70 = vector.extract_strided_slice %69 {offsets = [0, 0], sizes = [16, 1], strides = [1, 1]} : vector<16x128xf32> to vector<16x1xf32>
    %71 = vector.extract_strided_slice %69 {offsets = [0, 1], sizes = [16, 1], strides = [1, 1]} : vector<16x128xf32> to vector<16x1xf32>
    %cst_26 = arith.constant 1.000000e-03 : f32
    %cst_27 = arith.constant 9.990000e-01 : f32
    %72 = vector.broadcast %cst_26 : f32 to vector<16x1xf32>
    %73 = arith.maximumf %72, %70 : vector<16x1xf32>
    %74 = vector.broadcast %cst_27 : f32 to vector<16x1xf32>
    %75 = arith.minimumf %74, %73 : vector<16x1xf32>
    %cst_28 = arith.constant 1.000000e-03 : f32
    %cst_29 = arith.constant 9.990000e-01 : f32
    %76 = vector.broadcast %cst_28 : f32 to vector<16x1xf32>
    %77 = arith.maximumf %76, %71 : vector<16x1xf32>
    %78 = vector.broadcast %cst_29 : f32 to vector<16x1xf32>
    %79 = arith.minimumf %78, %77 : vector<16x1xf32>
    %cst_30 = arith.constant 1.000000e+00 : f32
    %80 = vector.broadcast %cst_30 : f32 to vector<16x1xf32>
    %81 = arith.subf %80, %75 : vector<16x1xf32>
    %cst_31 = arith.constant 1.000000e+00 : f32
    %82 = vector.broadcast %cst_31 : f32 to vector<16x1xf32>
    %83 = arith.subf %82, %79 : vector<16x1xf32>
    %84 = arith.mulf %81, %83 : vector<16x1xf32>
    %85 = arith.mulf %75, %79 : vector<16x1xf32>
    %86 = arith.divf %84, %85 : vector<16x1xf32>
    %87 = math.sqrt %86 : vector<16x1xf32>
    %cst_32 = arith.constant 1.000000e+00 : f32
    %88 = vector.broadcast %cst_32 : f32 to vector<16x1xf32>
    %89 = arith.addf %88, %87 : vector<16x1xf32>
    %cst_33 = arith.constant 1.000000e+00 : f32
    %90 = vector.broadcast %cst_33 : f32 to vector<16x1xf32>
    %91 = arith.divf %90, %89 : vector<16x1xf32>
    %92 = tpu.iota {dimensions = array<i32: 1>} : vector<16x64xi32>
    %93 = vector.extract_strided_slice %0 {offsets = [0, 0], sizes = [16, 64], strides = [1, 1]} : vector<16x128xf32> to vector<16x64xf32>
    %c32_i32 = arith.constant 32 : i32
    %94 = vector.broadcast %c32_i32 : i32 to vector<16x64xi32>
    %95 = arith.cmpi slt, %92, %94 : vector<16x64xi32>
    %96 = vector.broadcast %91 : vector<16x1xf32> to vector<16x64xf32>
    %97 = arith.mulf %93, %96 : vector<16x64xf32>
    %98 = vector.shape_cast %91 : vector<16x1xf32> to vector<16x1xf32>
    %99 = vector.broadcast %98 : vector<16x1xf32> to vector<16x64xf32>
    %100 = arith.select %95, %97, %99 : vector<16x64xi1>, vector<16x64xf32>
    %c0_34 = arith.constant 0 : index
    %c0_35 = arith.constant 0 : index
    %101 = vector.load %arg5[%c0_34, %c0_35] : memref<16x64xf32, #tpu.memory_space<vmem>>, vector<16x64xf32>
    tpu.vector_store %arg5[%c0_34, %c0_35], %100 {strides = array<i32>} : memref<16x64xf32, #tpu.memory_space<vmem>>, vector<16x64xf32>,
    return
  }
  func.func @transform_0(%arg0: i32) -> (i32, i32) {
    %c0_i32 = arith.constant 0 : i32
    %c0_i32_0 = arith.constant 0 : i32
    return %arg0, %c0_i32 : i32, i32
  }
  func.func @transform_1(%arg0: i32) -> (i32, i32) {
    %c0_i32 = arith.constant 0 : i32
    %c0_i32_0 = arith.constant 0 : i32
    %c0_i32_1 = arith.constant 0 : i32
    return %c0_i32, %c0_i32_0 : i32, i32
  }
  func.func @transform_2(%arg0: i32) -> (i32, i32) {
    %c0_i32 = arith.constant 0 : i32
    %c0_i32_0 = arith.constant 0 : i32
    %c0_i32_1 = arith.constant 0 : i32
    return %c0_i32, %c0_i32_0 : i32, i32
  }
  func.func @transform_3(%arg0: i32) -> (i32, i32) {
    %c0_i32 = arith.constant 0 : i32
    %c0_i32_0 = arith.constant 0 : i32
    %c0_i32_1 = arith.constant 0 : i32
    return %c0_i32, %c0_i32_0 : i32, i32
  }
  func.func @transform_4(%arg0: i32) -> (i32, i32) {
    %c0_i32 = arith.constant 0 : i32
    %c0_i32_0 = arith.constant 0 : i32
    return %arg0, %c0_i32 : i32, i32
  }
}

</mosaic_0001>

<bundles_post_ra>
// kernel: tpu_custom_call.1
= control target key start
LH: loop header
LB: loop body
LE: loop exit
PB: predicated region body
PF: predicated region fallthrough
CT: control target
= control target key end

     0   :  { %9 = vsyncpa [#allocation3], 0  ;;  %s807_s0 = inlined_call_operand.hbm [shape: f32[16,128], index: 0, kind: input, shape index: {}]   ;;  %s808_s1 = inlined_call_operand.hbm [shape: f32[2,128], index: 1, kind: input, shape index: {}]   ;;  %s809_s2 = inlined_call_operand.hbm [shape: f32[128,128], index: 2, kind: input, shape index: {}]   ;;  %s810_s3 = inlined_call_operand.hbm [shape: f32[128,128], index: 3, kind: input, shape index: {}]   ;;  %s811_s4 = inlined_call_operand.hbm [shape: f32[16,64], index: 4, kind: output, shape index: {}]  }
   0x1   :  { %10 = vsyncpa [#allocation6], 0 }
   0x2   :  { %11 = vsyncpa [#allocation9], 0 }
   0x3   :  { %12 = vsyncpa [#allocation4], 0  ;;  %s686_s15 = smov [#allocation5]   ;;  %s687_s17 = smov [#allocation2]  }
   0x4   :  { %s31_s16 = sshll.u32 %s686_s15, 4  ;;  %s18_s18 = sshll.u32 %s687_s17, 4  ;;  %s32_s16 = int_to_ptr.vmem [resolvable:$true] %s31_s16  ;;  %s19_s18 = int_to_ptr.vmem [resolvable:$true] %s18_s18 }
   0x5   :  { %s586_s19 = scalar_lea.vmem %s32_s16, 32  ;;  %p591_p1 = scmp.lt.s32.totalorder %s32_s16, %s32_s16 }
   0x6   :  { %p587_p0 = scmp.ne.s32.totalorder %s32_s16, %s586_s19  ;;  %p592_p2 = scmp.lt.s32.totalorder %s586_s19, %s586_s19 }
   0x8   :  { %p593_p3 = por %p592_p2, %p591_p1 }
   0xa   :  { %p594_p4 = pnand %p593_p3, %p587_p0 }
   0xc   :  { %597 = shalt.err (!%p594_p4)
}
   0xd   :  { %34 = dma.hbm_to_vmem [thread:$0]  %s808_s1, 32, %s32_s16, [#allocation6]  }
   0xe   :  { %s606_s22 = scalar_lea.vmem %s19_s18, 256  ;;  %p611_p6 = scmp.lt.s32.totalorder %s19_s18, %s19_s18 }
   0xf   :  { %p607_p5 = scmp.ne.s32.totalorder %s19_s18, %s606_s22  ;;  %p612_p7 = scmp.lt.s32.totalorder %s606_s22, %s606_s22 }
  0x11   :  { %p613_p8 = por %p612_p7, %p611_p6 }
  0x13   :  { %p614_p9 = pnand %p613_p8, %p607_p5 }
  0x15   :  { %617 = shalt.err (!%p614_p9)
}
  0x16   :  { %s688_s23 = smov 128   ;;  %s689_s24 = smov 8  }
  0x17   :  { %24 = dma.hbm_to_vmem [thread:$0]  %s807_s0, 256, %s19_s18, [#allocation3], %s688_s23, %s688_s23, %s689_s24  }
  0x18   :  { %s690_s27 = smov [#allocation7]   ;;  %s691_s29 = smov [#allocation8]  }
  0x19   :  { %s40_s28 = sshll.u32 %s690_s27, 4  ;;  %s52_s1 = sshll.u32 %s691_s29, 4  ;;  %s41_s28 = int_to_ptr.vmem [resolvable:$true] %s40_s28  ;;  %s53_s1 = int_to_ptr.vmem [resolvable:$true] %s52_s1 }
  0x1a   :  { %s626_s30 = scalar_lea.vmem %s41_s28, 2048  ;;  %p631_p11 = scmp.lt.s32.totalorder %s41_s28, %s41_s28 }
  0x1b   :  { %p627_p10 = scmp.ne.s32.totalorder %s41_s28, %s626_s30  ;;  %p632_p12 = scmp.lt.s32.totalorder %s626_s30, %s626_s30 }
  0x1d   :  { %p633_p13 = por %p632_p12, %p631_p11 }
  0x1f   :  { %p634_p0 = pnand %p633_p13, %p627_p10 }
  0x21   :  { %637 = shalt.err (!%p634_p0)
}
  0x22   :  { %46 = dma.hbm_to_vmem [thread:$0]  %s809_s2, 2048, %s41_s28, [#allocation6], %s688_s23, %s688_s23, %s689_s24  }
  0x23   :  { %s646_s0 = scalar_lea.vmem %s53_s1, 2048  ;;  %p651_p2 = scmp.lt.s32.totalorder %s53_s1, %s53_s1 }
  0x24   :  { %p647_p1 = scmp.ne.s32.totalorder %s53_s1, %s646_s0  ;;  %p652_p3 = scmp.lt.s32.totalorder %s646_s0, %s646_s0 }
  0x26   :  { %p653_p4 = por %p652_p3, %p651_p2 }
  0x28   :  { %p654_p5 = pnand %p653_p4, %p647_p1 }
  0x2a   :  { %657 = shalt.err (!%p654_p5)
}
  0x2b   :  { %58 = dma.hbm_to_vmem [thread:$0]  %s810_s3, 2048, %s53_s1, [#allocation9], %s688_s23, %s688_s23, %s689_s24  }
  0x2c   :  { %678 = dma.done.wait [#allocation3], 256  }
  0x2d   :  { %679 = vsyncadd [#allocation3], 4294967040 }
  0x2e   :  { %680 = dma.done.wait [#allocation6], 2080  }
  0x2f   :  { %681 = vsyncadd [#allocation6], 4294965216 }
  0x30   :  { %682 = dma.done.wait [#allocation9], 2048  }
  0x31   :  { %683 = vsyncadd [#allocation9], 4294965248  ;;  %v73_v0 = vlaneseq  ;;  %v746_v2 = vld [vmem:[#allocation2] sm:$0xff]  ;;  %v749_v3 = vld [vmem:[#allocation2 + $0x8] sm:$0xff]  ;;  %s692_s2 = smov 127   ;;  %vm409_vm9 = vcmask 523264  }
  0x32   :  { %v79_v4 = vmax.f32 %v746_v2, 0.0  ;;  %v80_v5 = vmax.f32 %v749_v3, 0.0  ;;  %v165_v31 = vld [vmem:[#allocation7 + $0x78] sm:$0xff]  ;;  %v164_v32 = vld [vmem:[#allocation7 + $0x70] sm:$0xff]  ;;  %v163_v33 = vld [vmem:[#allocation7 + $0x68] sm:$0xff]  ;;  %s694_s3 = smov [#allocation10]  }
  0x33   :  { %v742_v1 = vand.u32 127, %v73_v0  ;;  %469 = vmatprep.subr.mxu0 %v165_v31  ;;  %v162_v34 = vld [vmem:[#allocation7 + $0x60] sm:$0xff]  ;;  %v161_v35 = vld [vmem:[#allocation7 + $0x58] sm:$0xff]  ;;  %v160_v36 = vld [vmem:[#allocation7 + $0x50] sm:$0xff]  ;;  %v137_v59 = vshrl.u32 %v73_v0, 7  ;;  %s417_s9 = sshll.u32 %s694_s3, 4  ;;  %s418_s9 = int_to_ptr.vmem [resolvable:$true] %s417_s9 }
  0x34   :  { %470 = vmatpush3.msra.mxu0 %v165_v31  ;;  %v159_v37 = vld [vmem:[#allocation7 + $0x48] sm:$0xff]  ;;  %v158_v38 = vld [vmem:[#allocation7 + $0x40] sm:$0xff]  ;;  %v157_v39 = vld [vmem:[#allocation7 + $0x38] sm:$0xff]  ;;  %s658_s10 = scalar_lea.vmem %s418_s9, 256  ;;  %p663_p7 = scmp.lt.s32.totalorder %s418_s9, %s418_s9 }
  0x35   :  { %vm76_vm0 = vcmp.ge.s32.totalorder %v742_v1, 64  ;;  %vm77_vm1 = vcmp.lt.s32.totalorder %v742_v1, 80  ;;  %vm75_vm2 = vcmp.lt.s32.totalorder %v742_v1, 64  ;;  %471 = vmatprep.subr.mxu0 %v164_v32  ;;  %v156_v40 = vld [vmem:[#allocation7 + $0x30] sm:$0xff]  ;;  %v155_v41 = vld [vmem:[#allocation7 + $0x28] sm:$0xff]  ;;  %v154_v42 = vld [vmem:[#allocation7 + $0x20] sm:$0xff]  ;;  %p659_p6 = scmp.ne.s32.totalorder %s418_s9, %s658_s10  ;;  %p664_p8 = scmp.lt.s32.totalorder %s658_s10, %s658_s10 }
  0x36   :  { %vm753_vm3 = vmand %vm76_vm0, %vm77_vm1  ;;  %v81_v7 = vsel %vm75_vm2, %v79_v4, 0.0  ;;  %v82_v8 = vsel %vm75_vm2, %v80_v5, 0.0  ;;  %472 = vmatpush3.msra.mxu0 %v164_v32  ;;  %v153_v43 = vld [vmem:[#allocation7 + $0x18] sm:$0xff]  ;;  %v152_v44 = vld [vmem:[#allocation7 + $0x10] sm:$0xff]  ;;  %v138_v60 = vsub.s32 0, %v137_v59  ;;  %v144_v63 = vsub.s32 1, %v137_v59 }
  0x37   :  { %83 = vadd.xlane.f32.xlu0 %v81_v7  ;;  %85 = vadd.xlane.f32.xlu1 %v82_v8  ;;  %v105_v9 = vsel %vm753_vm3, %v746_v2, 0.0  ;;  %v106_v10 = vsel %vm753_vm3, %v749_v3, 0.0  ;;  %v151_v45 = vld [vmem:[#allocation7 + $0x8] sm:$0xff]  ;;  %v150_v46 = vld [vmem:[#allocation7] sm:$0xff]  ;;  %v135_v62 = vld [vmem:[#allocation5] sm:$0x3]  ;;  %p665_p9 = por %p664_p8, %p663_p7 }
  0x38   :  { %473 = vmatprep.subr.mxu0 %v163_v33  ;;  %v257_v31 = vld [vmem:[#allocation8 + $0x20] sm:$0xff]  ;;  %v256_v32 = vld [vmem:[#allocation8 + $0x18] sm:$0xff]  ;;  %vm394_vm8 = vcmp.lt.s32.totalorder %v742_v1, 32 }
  0x39   :  { %474 = vmatpush3.msra.mxu0 %v163_v33  ;;  %v255_v33 = vld [vmem:[#allocation8 + $0x10] sm:$0xff]  ;;  %p666_p10 = pnand %p665_p9, %p659_p6 }
  0x3a   :  { %475 = vmatprep.subr.mxu0 %v162_v34 }
  0x3b   :  { %107 = vadd.xlane.f32.xlu0 %v105_v9  ;;  %109 = vadd.xlane.f32.xlu1 %v106_v10  ;;  %v145_v10 = vrot.slane %v135_v62, %v144_v63 }
  0x3c   :  { %476 = vmatpush3.msra.mxu0 %v162_v34  ;;  %v254_v34 = vld [vmem:[#allocation8 + $0x8] sm:$0xff] }
  0x3d   :  { %477 = vmatprep.subr.mxu0 %v161_v35 }
  0x3e   :  { %478 = vmatpush3.msra.mxu0 %v161_v35  ;;  %v253_v35 = vld [vmem:[#allocation8] sm:$0xff] }
  0x3f   :  { %479 = vmatprep.subr.mxu0 %v160_v36 }
  0x40   :  { %480 = vmatpush3.msra.mxu0 %v160_v36 }
  0x41   :  { %481 = vmatprep.subr.mxu0 %v159_v37 }
  0x42   :  { %482 = vmatpush3.msra.mxu0 %v159_v37 }
  0x43   :  { %483 = vmatprep.subr.mxu0 %v158_v38 }
  0x44   :  { %484 = vmatpush3.msra.mxu0 %v158_v38 }
  0x45   :  { %485 = vmatprep.subr.mxu0 %v157_v39 }
  0x46   :  { %486 = vmatpush3.msra.mxu0 %v157_v39 }
  0x47   :  { %487 = vmatprep.subr.mxu0 %v156_v40 }
  0x48   :  { %488 = vmatpush3.msra.mxu0 %v156_v40 }
  0x49   :  { %489 = vmatprep.subr.mxu0 %v155_v41 }
  0x4a   :  { %490 = vmatpush3.msra.mxu0 %v155_v41 }
  0x4b   :  { %491 = vmatprep.subr.mxu0 %v154_v42 }
  0x4c   :  { %492 = vmatpush3.msra.mxu0 %v154_v42 }
  0x4d   :  { %493 = vmatprep.subr.mxu0 %v153_v43 }
  0x4e   :  { %494 = vmatpush3.msra.mxu0 %v153_v43 }
  0x4f   :  { %495 = vmatprep.subr.mxu0 %v152_v44 }
  0x50   :  { %496 = vmatpush3.msra.mxu0 %v152_v44 }
  0x51   :  { %497 = vmatprep.subr.mxu0 %v151_v45 }
  0x52   :  { %498 = vmatpush3.msra.mxu0 %v151_v45 }
  0x53   :  { %499 = vmatprep.subr.mxu0 %v150_v46 }
  0x54   :  { %500 = vmatpush3.msra.mxu0 %v150_v46 }
  0xc0   :  { %v84_v11 = vpop.xlane.xlu0 %83  ;;  %v86_v12 = vpop.xlane.xlu1 %85 }
  0xc1   :  { %v87_v13 = vmul.f32 0.015625, %v84_v11  ;;  %v88_v14 = vmul.f32 0.015625, %v86_v12 }
  0xc3   :  { %v89_v15 = vsub.f32 %v81_v7, %v87_v13  ;;  %v90_v16 = vsub.f32 %v82_v8, %v88_v14  ;;  %v139_v7 = vrot.slane %v135_v62, %v138_v60 }
  0xc4   :  { %v108_v17 = vpop.xlane.xlu0 %107  ;;  %v110_v18 = vpop.xlane.xlu1 %109 }
  0xc5   :  { %v111_v19 = vmul.f32 0.0625, %v108_v17  ;;  %v112_v20 = vmul.f32 0.0625, %v110_v18  ;;  %v769_v21 = vsel %vm75_vm2, %v89_v15, 0.0  ;;  %v773_v22 = vsel %vm75_vm2, %v90_v16, 0.0 }
  0xc6   :  { %v93_v23 = vmul.f32 %v769_v21, %v769_v21  ;;  %v94_v26 = vmul.f32 %v773_v22, %v773_v22 }
  0xc7   :  { %v113_v24 = vsub.f32 %v746_v2, %v111_v19  ;;  %v114_v25 = vsub.f32 %v749_v3, %v112_v20  ;;  %v268_v20 = vld [vmem:[#allocation8 + $0x78] sm:$0xff] }
  0xc8   :  { %95 = vadd.xlane.f32.xlu0 %v93_v23  ;;  %504 = vmatprep.subr.mxu1 %v268_v20  ;;  %v266_v23 = vld [vmem:[#allocation8 + $0x68] sm:$0xff] }
  0xc9   :  { %v783_v27 = vsel %vm753_vm3, %v113_v24, 0.0  ;;  %v787_v28 = vsel %vm753_vm3, %v114_v25, 0.0  ;;  %505 = vmatpush3.msra.mxu1 %v268_v20  ;;  %v264_v24 = vld [vmem:[#allocation8 + $0x58] sm:$0xff]  ;;  %v263_v25 = vld [vmem:[#allocation8 + $0x50] sm:$0xff] }
  0xca   :  { %v117_v29 = vmul.f32 %v783_v27, %v783_v27  ;;  %v118_v30 = vmul.f32 %v787_v28, %v787_v28 }
  0xcc   :  { %97 = vadd.xlane.f32.xlu0 %v94_v26  ;;  %119 = vadd.xlane.f32.xlu1 %v117_v29  ;;  %v262_v26 = vld [vmem:[#allocation8 + $0x48] sm:$0xff]  ;;  %v259_v29 = vld [vmem:[#allocation8 + $0x30] sm:$0xff] }
  0xd0   :  { %121 = vadd.xlane.f32.xlu1 %v118_v30  ;;  %v258_v30 = vld [vmem:[#allocation8 + $0x28] sm:$0xff] }
 0x151   :  { %v96_v47 = vpop.xlane.xlu0 %95 }
 0x152   :  { %v99_v48 = vmul.f32 0.015625, %v96_v47 }
 0x154   :  { %v101_v49 = vadd.f32 1e-05, %v99_v48 }
 0x155   :  { %v120_v50 = vpop.xlane.xlu1 %119  ;;  %v98_v51 = vpop.xlane.xlu0 %97 }
 0x156   :  { %v123_v52 = vmul.f32 0.0625, %v120_v50  ;;  %v100_v53 = vmul.f32 0.015625, %v98_v51  ;;  %550 = vrsqrt.f32 %v101_v49 }
 0x158   :  { %v125_v54 = vadd.f32 1e-05, %v123_v52  ;;  %v102_v55 = vadd.f32 1e-05, %v100_v53 }
 0x159   :  { %v122_v56 = vpop.xlane.xlu1 %121 }
 0x15a   :  { %552 = vrsqrt.f32 %v125_v54  ;;  %v124_v57 = vmul.f32 0.0625, %v122_v56  ;;  %v693_v54 = vmov 0  }
 0x15b   :  { %554 = vrsqrt.f32 %v102_v55  ;;  %549 = vset.pattern.permute.xlu1 %v693_v54  ;;  %548 = vset.pattern.permute.xlu0 %v693_v54 }
 0x15c   :  { %v126_v58 = vadd.f32 1e-05, %v124_v57 }
 0x15e   :  { %556 = vrsqrt.f32 %v126_v58 }
 0x163   :  { %v551_v61 = vpop.eup %550 }
 0x164   :  { %v129_v5 = vmul.f32 %v551_v61, %v769_v21  ;;  %v267_v21 = vld [vmem:[#allocation8 + $0x70] sm:$0xff] }
 0x165   :  { %506 = vmatprep.subr.mxu1 %v267_v21 }
 0x166   :  { %507 = vmatpush3.msra.mxu1 %v267_v21 }
 0x167   :  { %v553_v4 = vpop.eup %552  ;;  %508 = vmatprep.subr.mxu1 %v266_v23 }
 0x168   :  { %v131_v6 = vmul.f32 %v553_v4, %v783_v27  ;;  %v555_v8 = vpop.eup %554  ;;  %509 = vmatpush3.msra.mxu1 %v266_v23  ;;  %v261_v27 = vld [vmem:[#allocation8 + $0x40] sm:$0xff] }
 0x169   :  { %v130_v13 = vmul.f32 %v555_v8, %v773_v22  ;;  %v265_v22 = vld [vmem:[#allocation8 + $0x60] sm:$0xff] }
 0x16a   :  { %v133_v9 = vadd.f32 %v131_v6, %v129_v5  ;;  %510 = vmatprep.subr.mxu1 %v265_v22 }
 0x16b   :  { %v557_v11 = vpop.eup %556  ;;  %511 = vmatpush3.msra.mxu1 %v265_v22 }
 0x16c   :  { %v140_v12 = vmul.f32 %v139_v7, %v133_v9  ;;  %v132_v14 = vmul.f32 %v557_v11, %v787_v28  ;;  %512 = vmatprep.subr.mxu1 %v264_v24  ;;  %v260_v28 = vld [vmem:[#allocation8 + $0x38] sm:$0xff] }
 0x16d   :  { %513 = vmatpush3.msra.mxu1 %v264_v24 }
 0x16e   :  { %v146_v0 = vadd.f32 %v145_v10, %v140_v12  ;;  %v134_v15 = vadd.f32 %v132_v14, %v130_v13  ;;  %514 = vmatprep.subr.mxu1 %v263_v25 }
 0x16f   :  { %515 = vmatpush3.msra.mxu1 %v263_v25 }
 0x170   :  { %v148_v16 = vmax.f32 %v146_v0, 0.0  ;;  %v141_v17 = vmul.f32 %v139_v7, %v134_v15  ;;  %516 = vmatprep.subr.mxu1 %v262_v26 }
 0x171   :  { %517 = vmatpush3.msra.mxu1 %v262_v26 }
 0x172   :  { %501 = vmatprep.mubr.f32.mxu0 %v148_v16  ;;  %v147_v18 = vadd.f32 %v145_v10, %v141_v17  ;;  %518 = vmatprep.subr.mxu1 %v261_v27 }
 0x173   :  { %519 = vmatpush3.msra.mxu1 %v261_v27 }
 0x174   :  { %v149_v19 = vmax.f32 %v147_v18, 0.0  ;;  %520 = vmatprep.subr.mxu1 %v260_v28 }
 0x175   :  { %521 = vmatpush3.msra.mxu1 %v260_v28 }
 0x176   :  { %502 = vmatmul.mubr.f32.vlgmr.msra.gmra.mxu0 %v149_v19  ;;  %522 = vmatprep.subr.mxu1 %v259_v29 }
 0x177   :  { %523 = vmatpush3.msra.mxu1 %v259_v29 }
 0x178   :  { %524 = vmatprep.subr.mxu1 %v258_v30 }
 0x179   :  { %525 = vmatpush3.msra.mxu1 %v258_v30 }
 0x17a   :  { %526 = vmatprep.subr.mxu1 %v257_v31 }
 0x17b   :  { %527 = vmatpush3.msra.mxu1 %v257_v31 }
 0x17c   :  { %528 = vmatprep.subr.mxu1 %v256_v32 }
 0x17d   :  { %529 = vmatpush3.msra.mxu1 %v256_v32 }
 0x17e   :  { %530 = vmatprep.subr.mxu1 %v255_v33 }
 0x17f   :  { %531 = vmatpush3.msra.mxu1 %v255_v33 }
 0x180   :  { %532 = vmatprep.subr.mxu1 %v254_v34 }
 0x181   :  { %533 = vmatpush3.msra.mxu1 %v254_v34 }
 0x182   :  { %534 = vmatprep.subr.mxu1 %v253_v35 }
 0x183   :  { %535 = vmatpush3.msra.mxu1 %v253_v35 }
 0x236   :  { %v503_v36 = vpop.f32.mrf.mxu0 }
 0x237   :  { %v432_v37 = vmul.f32 -1.442695, %v503_v36 }
 0x238   :  { %v232_v38 = vpop.f32.mrf.mxu0 }
 0x239   :  { %558 = vpow2.f32 %v432_v37  ;;  %v431_v39 = vmul.f32 -1.442695, %v232_v38 }
 0x23b   :  { %560 = vpow2.f32 %v431_v39 }
 0x246   :  { %v559_v40 = vpop.eup %558 }
 0x247   :  { %v248_v42 = vadd.f32 1.0, %v559_v40 }
 0x248   :  { %v561_v41 = vpop.eup %560 }
 0x249   :  { %v247_v43 = vadd.f32 1.0, %v561_v41 }
 0x24b   :  { %562 = vrcp.f32 %v247_v43 }
 0x24c   :  { %564 = vrcp.f32 %v248_v42 }
 0x258   :  { %v563_v44 = vpop.eup %562 }
 0x259   :  { %v565_v45 = vpop.eup %564  ;;  %536 = vmatprep.mubr.f32.mxu1 %v563_v44 }
 0x25a   :  { %537 = vmatmul.mubr.f32.vlgmr.msra.gmra.mxu1 %v565_v45 }
 0x31a   :  { %v538_v46 = vpop.f32.mrf.mxu1 }
 0x31b   :  { %v345_v47 = vmax.f32 %v538_v46, 0.001 }
 0x31c   :  { %v335_v48 = vpop.f32.mrf.mxu1 }
 0x31d   :  { %v347_v49 = vmin.f32 %v345_v47, 0.999  ;;  %v344_v50 = vmax.f32 %v335_v48, 0.001 }
 0x31f   :  { %v346_v51 = vmin.f32 %v344_v50, 0.999  ;;  %364 = vrot.lane.b32.xlu1 %v347_v49, %s692_s2  ;;  %v349_v53 = vsub.f32 1.0, %v347_v49 }
 0x321   :  { %362 = vrot.lane.b32.xlu0 %v346_v51, %s692_s2  ;;  %v348_v52 = vsub.f32 1.0, %v346_v51 }
 0x323   :  { %352 = vrot.lane.b32.xlu1 %v348_v52, %s692_s2 }
 0x327   :  { %354 = vrot.lane.b32.xlu1 %v349_v53, %s692_s2 }
 0x391   :  { %v365_v55 = vpop.permute.xlu1 %364 }
 0x392   :  { %v369_v56 = vmul.f32 %v365_v55, %v347_v49 }
 0x393   :  { %v363_v57 = vpop.permute.xlu0 %362 }
 0x394   :  { %566 = vrcp.f32 %v369_v56  ;;  %v368_v58 = vmul.f32 %v363_v57, %v346_v51 }
 0x395   :  { %v353_v59 = vpop.permute.xlu1 %352 }
 0x396   :  { %568 = vrcp.f32 %v368_v58  ;;  %v358_v63 = vmul.f32 %v353_v59, %v348_v52 }
 0x399   :  { %v355_v60 = vpop.permute.xlu1 %354 }
 0x39a   :  { %v359_v61 = vmul.f32 %v355_v60, %v349_v53 }
 0x3a1   :  { %v567_v62 = vpop.eup %566 }
 0x3a2   :  { %v373_v4 = vmul.f32 %v567_v62, %v359_v61 }
 0x3a3   :  { %v569_v5 = vpop.eup %568 }
 0x3a4   :  { %v371_v6 = vmul.f32 %v569_v5, %v358_v63  ;;  %570 = vrsqrt.f32 %v373_v4  ;;  %vm383_vm4 = vcmp.eq.f32.partialorder %v373_v4, inf  ;;  %v386_v10 = vand.u32 2147483648, %v373_v4 }
 0x3a5   :  { %vm385_vm5 = vcmp.eq.f32.partialorder %v373_v4, 0.0 }
 0x3a6   :  { %572 = vrsqrt.f32 %v371_v6  ;;  %vm376_vm6 = vcmp.eq.f32.partialorder %v371_v6, inf  ;;  %v379_v13 = vand.u32 2147483648, %v371_v6  ;;  %vm378_vm7 = vcmp.eq.f32.partialorder %v371_v6, 0.0 }
 0x3b1   :  { %v571_v7 = vpop.eup %570 }
 0x3b2   :  { %v382_v8 = vmul.f32 %v571_v7, %v373_v4 }
 0x3b3   :  { %v573_v9 = vpop.eup %572 }
 0x3b4   :  { %v375_v11 = vmul.f32 %v573_v9, %v371_v6  ;;  %v384_v12 = vsel %vm383_vm4, %v373_v4, %v382_v8 }
 0x3b5   :  { %v387_v14 = vsel %vm385_vm5, %v386_v10, %v384_v12 }
 0x3b6   :  { %v377_v0 = vsel %vm376_vm6, %v371_v6, %v375_v11  ;;  %v389_v15 = vadd.f32 1.0, %v387_v14 }
 0x3b7   :  { %v380_v16 = vsel %vm378_vm7, %v379_v13, %v377_v0 }
 0x3b8   :  { %v388_v17 = vadd.f32 1.0, %v380_v16  ;;  %574 = vrcp.f32 %v389_v15 }
 0x3ba   :  { %576 = vrcp.f32 %v388_v17 }
 0x3c5   :  { %v575_v18 = vpop.eup %574 }
 0x3c6   :  { %402 = vperm.xlu1 %549, %v575_v18  }
 0x3c7   :  { %v577_v19 = vpop.eup %576 }
 0x3c8   :  { %397 = vperm.xlu0 %548, %v577_v19  }
 0x441   :  { %v403_v20 = vpop.permute.xlu1 %402 }
 0x442   :  { %v406_v21 = vmul.f32 %v403_v20, %v749_v3 }
 0x443   :  { %v398_v23 = vpop.permute.xlu0 %397 }
 0x444   :  { %v408_v22 = vsel %vm394_vm8, %v406_v21, %v403_v20  ;;  %v405_v24 = vmul.f32 %v398_v23, %v746_v2 }
 0x445   :  { %411 = vst.msk [vmem:[#allocation10 + $0x8] sm:$0xff] %vm409_vm9, %v408_v22 }
 0x446   :  { %v407_v25 = vsel %vm394_vm8, %v405_v24, %v398_v23 }
 0x447   :  { %410 = vst.msk [vmem:[#allocation10] sm:$0xff] %vm409_vm9, %v407_v25 }
 0x448   :  { %669 = shalt.err (!%p666_p10)
}
 0x449   :  { %423 = dma.vmem_to_hbm [thread:$0]  %s418_s9, 256, %s811_s4, [#allocation4], %s688_s23, %s688_s23, %s689_s24  }
 0x44a   :  { %684 = dma.done.wait [#allocation4], 256  }
 0x44b   :  { %685 = vsyncadd [#allocation4], 4294967040 }
 0x44c   :  { %427 = vsyncpa [#allocation3], 1 }
 0x44d   :  { %428 = vsyncpa [#allocation6], 1 }
 0x44e   :  { %429 = vsyncpa [#allocation9], 1 }
 0x44f   :  { %430 = vsyncpa [#allocation4], 1 }

</bundles_post_ra>
